<compile_context>
chip_gen: v7x
topology: tpu7x:2x2x1
jax: 0.10.0
libtpu: 0.0.40
codegen_flags: <defaults>
</compile_context>

<pallas_src>
import functools

import jax
import jax.numpy as jnp
from jax.experimental import pallas as pl
from jax.experimental.pallas import tpu as pltpu


def _round_up(n, m):
    return ((n + m - 1) // m) * m


def _film_kernel(film_ref, tbf_ref, wg_ref, bg_ref, wb_ref, bb_ref,
                 wout_ref, bout_ref, out_ref):
    """Fused FiLM forward for one batch tile.

    film_ref : [TB, D]     conditioning input (goes through fc)
    tbf_ref  : [TB, D]     input to be modulated
    wg_ref   : [D, D]      gamma half of fc weight, (in, out) layout
    bg_ref   : [1, D]      gamma half of fc bias
    wb_ref   : [D, D]      beta half of fc weight, (in, out) layout
    bb_ref   : [1, D]      beta half of fc bias
    wout_ref : [D, Opad]   fc_out weight, (in, out) layout, lane-padded
    bout_ref : [1, Opad]   fc_out bias, lane-padded
    out_ref  : [TB, Opad]
    """
    film = film_ref[...]                       # keep native dtype for the MXU
    tbf = tbf_ref[...].astype(jnp.float32)     # elementwise math in f32

    # gamma / beta as two separate dots: no [TB, 2D] intermediate, no slicing.
    gamma = jnp.dot(film, wg_ref[...], preferred_element_type=jnp.float32)
    gamma = gamma + bg_ref[...].astype(jnp.float32)
    beta = jnp.dot(film, wb_ref[...], preferred_element_type=jnp.float32)
    beta = beta + bb_ref[...].astype(jnp.float32)

    # FiLM modulation (f32 on the VPU).
    modulated = gamma * tbf + beta             # [TB, D]

    # Second projection: cast the activation to the weight dtype so bf16
    # weights keep full MXU throughput; accumulate in f32.
    out = jnp.dot(modulated.astype(wout_ref.dtype), wout_ref[...],
                  preferred_element_type=jnp.float32)
    out = out + bout_ref[...].astype(jnp.float32)

    out_ref[...] = out.astype(out_ref.dtype)


def prepare_film_params(w_fc, b_fc, w_out, b_out):
    """One-time parameter preparation (call OUTSIDE the per-step hot path).

    w_fc  : [2D, D]  PyTorch nn.Linear layout [out_features, in_features]
    b_fc  : [2D]
    w_out : [O, D]
    b_out : [O]

    Returns a dict of kernel-ready (in, out)-layout, lane-padded parameters.
    """
    two_d, d = w_fc.shape
    assert two_d == 2 * d, "fc must map input_dim -> 2*dim with input_dim == dim"
    o = w_out.shape[0]
    o_pad = _round_up(o, 128)

    wg = jnp.transpose(w_fc[:d])               # [D, D]  gamma projection
    wb = jnp.transpose(w_fc[d:])               # [D, D]  beta projection
    bg = b_fc[:d].reshape(1, d)
    bb = b_fc[d:].reshape(1, d)

    wout_t = jnp.transpose(w_out)              # [D, O]
    if o_pad != o:
        wout_t = jnp.pad(wout_t, ((0, 0), (0, o_pad - o)))
        bout = jnp.pad(b_out, (0, o_pad - o)).reshape(1, o_pad)
    else:
        bout = b_out.reshape(1, o_pad)

    return dict(wg=wg, bg=bg, wb=wb, bb=bb, wout=wout_t, bout=bout,
                dim=d, out_dim=o, out_dim_padded=o_pad)


def film_forward(x, y, params, x_film=True, block_b=256):
    """FiLM forward. x, y: [B, D]; params from prepare_film_params()."""
    film, to_be_film = (x, y) if x_film else (y, x)
    assert film.shape == to_be_film.shape, "FiLM requires input_dim == dim"

    B, D = film.shape
    assert D == params["dim"]
    O = params["out_dim"]
    O_pad = params["out_dim_padded"]

    # Batch tile: multiple of 8 sublanes, capped by block_b, double-buffered by
    # the BlockSpec pipeline.
    TB = min(_round_up(block_b, 8), _round_up(B, 8))
    B_pad = _round_up(B, TB)
    if B_pad != B:
        pad = B_pad - B
        film = jnp.pad(film, ((0, pad), (0, 0)))
        to_be_film = jnp.pad(to_be_film, ((0, pad), (0, 0)))

    grid = (B_pad // TB,)

    act_spec = pl.BlockSpec((TB, D), lambda i: (i, 0))
    const = lambda shape: pl.BlockSpec(shape, lambda i: (0, 0))

    out_padded = pl.pallas_call(
        _film_kernel,
        out_shape=jax.ShapeDtypeStruct((B_pad, O_pad), x.dtype),
        grid=grid,
        in_specs=[
            act_spec,                    # film       [TB, D]
            act_spec,                    # to_be_film [TB, D]
            const((D, D)),               # W_gamma
            const((1, D)),               # b_gamma
            const((D, D)),               # W_beta
            const((1, D)),               # b_beta
            const((D, O_pad)),           # W_out^T (padded)
            const((1, O_pad)),           # b_out   (padded)
        ],
        out_specs=pl.BlockSpec((TB, O_pad), lambda i: (i, 0)),
        compiler_params=pltpu.CompilerParams(
            dimension_semantics=("parallel",)),
    )(film, to_be_film,
      params["wg"], params["bg"], params["wb"], params["bb"],
      params["wout"], params["bout"])

    return out_padded[:B, :O]


def film_reference(x, y, w_fc, b_fc, w_out, b_out, x_film=True):
    """Pure-JAX reference mirroring the PyTorch forward."""
    film, to_be_film = (x, y) if x_film else (y, x)
    d = to_be_film.shape[-1]
    h = film @ w_fc.T + b_fc
    gamma, beta = h[:, :d], h[:, d:]
    out = gamma * to_be_film + beta
    return out @ w_out.T + b_out


if __name__ == "__main__":
    # Small shapes consistent with the module (input_dim == dim required by the
    # split/modulation; output_dim=100 matches the PyTorch default and
    # exercises the lane-padding path).
    B = 64         # batch
    D = 128        # input_dim == dim
    O = 100        # output_dim

    key = jax.random.PRNGKey(0)
    kx, ky, kw1, kb1, kw2, kb2 = jax.random.split(key, 6)

    x = jax.random.normal(kx, (B, D), dtype=jnp.float32)
    y = jax.random.normal(ky, (B, D), dtype=jnp.float32)

    # PyTorch nn.Linear weight layout: [out_features, in_features].
    w_fc = jax.random.normal(kw1, (2 * D, D), dtype=jnp.float32) * 0.05
    b_fc = jax.random.normal(kb1, (2 * D,), dtype=jnp.float32) * 0.05
    w_out = jax.random.normal(kw2, (O, D), dtype=jnp.float32) * 0.05
    b_out = jax.random.normal(kb2, (O,), dtype=jnp.float32) * 0.05

    # One-time parameter prep (outside the hot path).
    params = jax.tree.map(jax.block_until_ready,
                          prepare_film_params(w_fc, b_fc, w_out, b_out)
                          if False else prepare_film_params(w_fc, b_fc, w_out, b_out))

    fwd = functools.partial(film_forward, params=params, block_b=256)

    for x_film in (True, False):
        out = jax.block_until_ready(fwd(x, y, x_film=x_film))
        ref = film_reference(x, y, w_fc, b_fc, w_out, b_out, x_film=x_film)
        assert out.shape == (B, O), out.shape
        assert jnp.allclose(out, ref, atol=1e-4, rtol=1e-4), (
            f"x_film={x_film}: max abs err = {jnp.max(jnp.abs(out - ref))}")

    print("KERNEL_OK")
</pallas_src>

<mosaic_0001>
module attributes {stable_mosaic.version = 11 : i64} {
  func.func @_film_kernel(%arg0: i32, %arg1: memref<64x128xf32, #tpu.memory_space<vmem>>, %arg2: memref<64x128xf32, #tpu.memory_space<vmem>>, %arg3: memref<128x128xf32, #tpu.memory_space<vmem>>, %arg4: memref<1x128xf32, #tpu.memory_space<vmem>>, %arg5: memref<128x128xf32, #tpu.memory_space<vmem>>, %arg6: memref<1x128xf32, #tpu.memory_space<vmem>>, %arg7: memref<128x128xf32, #tpu.memory_space<vmem>>, %arg8: memref<1x128xf32, #tpu.memory_space<vmem>>, %arg9: memref<64x128xf32, #tpu.memory_space<vmem>>) attributes {dimension_semantics = [#tpu.dimension_semantics<parallel>], iteration_bounds = array<i64: 1>, scalar_prefetch = 0 : i64, scratch_operands = 0 : i64, tpu.core_type = #tpu.core_type<tc>, window_params = [{transform_indices = @transform_0, window_bounds = array<i64: 64, 128>}, {transform_indices = @transform_1, window_bounds = array<i64: 64, 128>}, {pipeline_mode = #tpu.pipeline_mode<synchronous>, transform_indices = @transform_2, window_bounds = array<i64: 128, 128>}, {pipeline_mode = #tpu.pipeline_mode<synchronous>, transform_indices = @transform_3, window_bounds = array<i64: 1, 128>}, {pipeline_mode = #tpu.pipeline_mode<synchronous>, transform_indices = @transform_4, window_bounds = array<i64: 128, 128>}, {pipeline_mode = #tpu.pipeline_mode<synchronous>, transform_indices = @transform_5, window_bounds = array<i64: 1, 128>}, {pipeline_mode = #tpu.pipeline_mode<synchronous>, transform_indices = @transform_6, window_bounds = array<i64: 128, 128>}, {pipeline_mode = #tpu.pipeline_mode<synchronous>, transform_indices = @transform_7, window_bounds = array<i64: 1, 128>}, {transform_indices = @transform_8, window_bounds = array<i64: 64, 128>}]} {
    %c0 = arith.constant 0 : index
    %c0_0 = arith.constant 0 : index
    %0 = vector.load %arg1[%c0, %c0_0] : memref<64x128xf32, #tpu.memory_space<vmem>>, vector<64x128xf32>
    %c0_1 = arith.constant 0 : index
    %c0_2 = arith.constant 0 : index
    %1 = vector.load %arg2[%c0_1, %c0_2] : memref<64x128xf32, #tpu.memory_space<vmem>>, vector<64x128xf32>
    %c0_3 = arith.constant 0 : index
    %c0_4 = arith.constant 0 : index
    %2 = vector.load %arg3[%c0_3, %c0_4] : memref<128x128xf32, #tpu.memory_space<vmem>>, vector<128x128xf32>
    %cst = arith.constant dense<0.000000e+00> : vector<64x128xf32>
    %3 = tpu.matmul %0, %2, %cst {dimension_numbers = #tpu.dot_dimension_numbers<[1], [0], [0], [1], [0, 0, 1, 1], [], []>} : vector<64x128xf32>, vector<128x128xf32>, vector<64x128xf32> -> vector<64x128xf32>
    %c0_5 = arith.constant 0 : index
    %c0_6 = arith.constant 0 : index
    %4 = vector.load %arg4[%c0_5, %c0_6] : memref<1x128xf32, #tpu.memory_space<vmem>>, vector<1x128xf32>
    %5 = vector.broadcast %4 : vector<1x128xf32> to vector<64x128xf32>
    %6 = arith.addf %3, %5 : vector<64x128xf32>
    %c0_7 = arith.constant 0 : index
    %c0_8 = arith.constant 0 : index
    %7 = vector.load %arg5[%c0_7, %c0_8] : memref<128x128xf32, #tpu.memory_space<vmem>>, vector<128x128xf32>
    %cst_9 = arith.constant dense<0.000000e+00> : vector<64x128xf32>
    %8 = tpu.matmul %0, %7, %cst_9 {dimension_numbers = #tpu.dot_dimension_numbers<[1], [0], [0], [1], [0, 0, 1, 1], [], []>} : vector<64x128xf32>, vector<128x128xf32>, vector<64x128xf32> -> vector<64x128xf32>
    %c0_10 = arith.constant 0 : index
    %c0_11 = arith.constant 0 : index
    %9 = vector.load %arg6[%c0_10, %c0_11] : memref<1x128xf32, #tpu.memory_space<vmem>>, vector<1x128xf32>
    %10 = vector.broadcast %9 : vector<1x128xf32> to vector<64x128xf32>
    %11 = arith.addf %8, %10 : vector<64x128xf32>
    %12 = arith.mulf %6, %1 : vector<64x128xf32>
    %13 = arith.addf %12, %11 : vector<64x128xf32>
    %c0_12 = arith.constant 0 : index
    %c0_13 = arith.constant 0 : index
    %14 = vector.load %arg7[%c0_12, %c0_13] : memref<128x128xf32, #tpu.memory_space<vmem>>, vector<128x128xf32>
    %cst_14 = arith.constant dense<0.000000e+00> : vector<64x128xf32>
    %15 = tpu.matmul %13, %14, %cst_14 {dimension_numbers = #tpu.dot_dimension_numbers<[1], [0], [0], [1], [0, 0, 1, 1], [], []>} : vector<64x128xf32>, vector<128x128xf32>, vector<64x128xf32> -> vector<64x128xf32>
    %c0_15 = arith.constant 0 : index
    %c0_16 = arith.constant 0 : index
    %16 = vector.load %arg8[%c0_15, %c0_16] : memref<1x128xf32, #tpu.memory_space<vmem>>, vector<1x128xf32>
    %17 = vector.broadcast %16 : vector<1x128xf32> to vector<64x128xf32>
    %18 = arith.addf %15, %17 : vector<64x128xf32>
    %c0_17 = arith.constant 0 : index
    %c0_18 = arith.constant 0 : index
    %19 = vector.load %arg9[%c0_17, %c0_18] : memref<64x128xf32, #tpu.memory_space<vmem>>, vector<64x128xf32>
    tpu.vector_store %arg9[%c0_17, %c0_18], %18 {strides = array<i32>} : memref<64x128xf32, #tpu.memory_space<vmem>>, vector<64x128xf32>,
    return
  }
  func.func @transform_0(%arg0: i32) -> (i32, i32) {
    %c0_i32 = arith.constant 0 : i32
    %c0_i32_0 = arith.constant 0 : i32
    return %arg0, %c0_i32 : i32, i32
  }
  func.func @transform_1(%arg0: i32) -> (i32, i32) {
    %c0_i32 = arith.constant 0 : i32
    %c0_i32_0 = arith.constant 0 : i32
    return %arg0, %c0_i32 : i32, i32
  }
  func.func @transform_2(%arg0: i32) -> (i32, i32) {
    %c0_i32 = arith.constant 0 : i32
    %c0_i32_0 = arith.constant 0 : i32
    %c0_i32_1 = arith.constant 0 : i32
    return %c0_i32, %c0_i32_0 : i32, i32
  }
  func.func @transform_3(%arg0: i32) -> (i32, i32) {
    %c0_i32 = arith.constant 0 : i32
    %c0_i32_0 = arith.constant 0 : i32
    %c0_i32_1 = arith.constant 0 : i32
    return %c0_i32, %c0_i32_0 : i32, i32
  }
  func.func @transform_4(%arg0: i32) -> (i32, i32) {
    %c0_i32 = arith.constant 0 : i32
    %c0_i32_0 = arith.constant 0 : i32
    %c0_i32_1 = arith.constant 0 : i32
    return %c0_i32, %c0_i32_0 : i32, i32
  }
  func.func @transform_5(%arg0: i32) -> (i32, i32) {
    %c0_i32 = arith.constant 0 : i32
    %c0_i32_0 = arith.constant 0 : i32
    %c0_i32_1 = arith.constant 0 : i32
    return %c0_i32, %c0_i32_0 : i32, i32
  }
  func.func @transform_6(%arg0: i32) -> (i32, i32) {
    %c0_i32 = arith.constant 0 : i32
    %c0_i32_0 = arith.constant 0 : i32
    %c0_i32_1 = arith.constant 0 : i32
    return %c0_i32, %c0_i32_0 : i32, i32
  }
  func.func @transform_7(%arg0: i32) -> (i32, i32) {
    %c0_i32 = arith.constant 0 : i32
    %c0_i32_0 = arith.constant 0 : i32
    %c0_i32_1 = arith.constant 0 : i32
    return %c0_i32, %c0_i32_0 : i32, i32
  }
  func.func @transform_8(%arg0: i32) -> (i32, i32) {
    %c0_i32 = arith.constant 0 : i32
    %c0_i32_0 = arith.constant 0 : i32
    return %arg0, %c0_i32 : i32, i32
  }
}

</mosaic_0001>

<bundles_post_ra>
// kernel: tpu_custom_call.1
= control target key start
LH: loop header
LB: loop body
LE: loop exit
PB: predicated region body
PF: predicated region fallthrough
CT: control target
= control target key end

     0   :  { %13 = vsyncpa [#allocation3], 0  ;;  %s1174_s0 = inlined_call_operand.hbm [shape: f32[64,128], index: 0, kind: input, shape index: {}]   ;;  %s1175_s1 = inlined_call_operand.hbm [shape: f32[64,128], index: 1, kind: input, shape index: {}]   ;;  %s1176_s2 = inlined_call_operand.hbm [shape: f32[128,128], index: 2, kind: input, shape index: {}]   ;;  %s1177_s3 = inlined_call_operand.vmem [shape: f32[1,128], index: 3, kind: input, shape index: {}]   ;;  %s1178_s4 = inlined_call_operand.hbm [shape: f32[128,128], index: 4, kind: input, shape index: {}]   ;;  %s1179_s5 = inlined_call_operand.vmem [shape: f32[1,128], index: 5, kind: input, shape index: {}]   ;;  %s1180_s6 = inlined_call_operand.hbm [shape: f32[128,128], index: 6, kind: input, shape index: {}]   ;;  %s1181_s7 = inlined_call_operand.vmem [shape: f32[1,128], index: 7, kind: input, shape index: {}]   ;;  %s1182_s8 = inlined_call_operand.hbm [shape: f32[64,128], index: 8, kind: output, shape index: {}]  }
   0x1   :  { %14 = vsyncpa [#allocation6], 0 }
   0x2   :  { %15 = vsyncpa [#allocation9], 0 }
   0x3   :  { %16 = vsyncpa [#allocation4], 0  ;;  %s1008_s27 = smov [#allocation5]   ;;  %s1009_s29 = smov [#allocation8]  }
   0x4   :  { %s34_s28 = sshll.u32 %s1008_s27, 4  ;;  %s60_s30 = sshll.u32 %s1009_s29, 4  ;;  %s35_s28 = int_to_ptr.vmem [resolvable:$true] %s34_s28  ;;  %s1061_s30 = int_to_ptr.vmem [resolvable:$true] %s60_s30 }
   0x5   :  { %s868_s11 = scalar_lea.hbm %s1175_s1, 1024 }
   0x6   :  { %p869_p0 = scmp.ne.s32.totalorder %s1175_s1, %s868_s11  ;;  %p872_p1 = scmp.lt.u32.totalorder %s868_s11, %s1175_s1 }
   0x8   :  { %p874_p2 = pnand %p872_p1, %p869_p0 }
   0xa   :  { %877 = shalt.err (!%p874_p2)
}
   0xb   :  { %s878_s16 = scalar_lea.vmem %s35_s28, 1024  ;;  %p883_p4 = scmp.lt.s32.totalorder %s35_s28, %s35_s28 }
   0xc   :  { %p879_p3 = scmp.ne.s32.totalorder %s35_s28, %s878_s16  ;;  %p884_p5 = scmp.lt.s32.totalorder %s878_s16, %s878_s16 }
   0xe   :  { %p885_p6 = por %p884_p5, %p883_p4 }
  0x10   :  { %p886_p7 = pnand %p885_p6, %p879_p3 }
  0x12   :  { %889 = shalt.err (!%p886_p7)
}
  0x13   :  { %s1010_s17 = smov 128   ;;  %s1011_s18 = smov 8  }
  0x14   :  { %40 = dma.hbm_to_vmem [thread:$0]  %s1175_s1, 1024, %s35_s28, [#allocation6], %s1010_s17, %s1010_s17, %s1011_s18  }
  0x15   :  { %s890_s23 = scalar_lea.hbm %s1178_s4, 2048 }
  0x16   :  { %p891_p8 = scmp.ne.s32.totalorder %s1178_s4, %s890_s23  ;;  %p894_p9 = scmp.lt.u32.totalorder %s890_s23, %s1178_s4 }
  0x18   :  { %p896_p10 = pnand %p894_p9, %p891_p8 }
  0x1a   :  { %899 = shalt.err (!%p896_p10)
}
  0x1b   :  { %s900_s29 = scalar_lea.vmem %s1061_s30, 2048  ;;  %p905_p12 = scmp.lt.s32.totalorder %s1061_s30, %s1061_s30 }
  0x1c   :  { %p901_p11 = scmp.ne.s32.totalorder %s1061_s30, %s900_s29  ;;  %p906_p13 = scmp.lt.s32.totalorder %s900_s29, %s900_s29 }
  0x1e   :  { %p907_p0 = por %p906_p13, %p905_p12 }
  0x20   :  { %p908_p1 = pnand %p907_p0, %p901_p11 }
  0x22   :  { %911 = shalt.err (!%p908_p1)
}
  0x23   :  { %66 = dma.hbm_to_vmem [thread:$0]  %s1178_s4, 2048, %s1061_s30, [#allocation9], %s1010_s17, %s1010_s17, %s1011_s18  }
  0x24   :  { %s1012_s9 = smov [#allocation2]   ;;  %s1013_s11 = smov [#allocation7]  }
  0x25   :  { %s22_s10 = sshll.u32 %s1012_s9, 4  ;;  %s46_s12 = sshll.u32 %s1013_s11, 4  ;;  %s23_s10 = int_to_ptr.vmem [resolvable:$true] %s22_s10  ;;  %s1098_s12 = int_to_ptr.vmem [resolvable:$true] %s46_s12 }
  0x26   :  { %s912_s15 = scalar_lea.hbm %s1174_s0, 1024 }
  0x27   :  { %p913_p2 = scmp.ne.s32.totalorder %s1174_s0, %s912_s15  ;;  %p916_p3 = scmp.lt.u32.totalorder %s912_s15, %s1174_s0 }
  0x29   :  { %p918_p4 = pnand %p916_p3, %p913_p2 }
  0x2b   :  { %921 = shalt.err (!%p918_p4)
}
  0x2c   :  { %s922_s4 = scalar_lea.vmem %s23_s10, 1024  ;;  %p927_p6 = scmp.lt.s32.totalorder %s23_s10, %s23_s10 }
  0x2d   :  { %p923_p5 = scmp.ne.s32.totalorder %s23_s10, %s922_s4  ;;  %p928_p7 = scmp.lt.s32.totalorder %s922_s4, %s922_s4 }
  0x2f   :  { %p929_p8 = por %p928_p7, %p927_p6 }
  0x31   :  { %p930_p9 = pnand %p929_p8, %p923_p5 }
  0x33   :  { %933 = shalt.err (!%p930_p9)
}
  0x34   :  { %28 = dma.hbm_to_vmem [thread:$0]  %s1174_s0, 1024, %s23_s10, [#allocation3], %s1010_s17, %s1010_s17, %s1011_s18  }
  0x35   :  { %s934_s25 = scalar_lea.hbm %s1176_s2, 2048 }
  0x36   :  { %p935_p10 = scmp.ne.s32.totalorder %s1176_s2, %s934_s25  ;;  %p938_p11 = scmp.lt.u32.totalorder %s934_s25, %s1176_s2 }
  0x38   :  { %p940_p12 = pnand %p938_p11, %p935_p10 }
  0x3a   :  { %943 = shalt.err (!%p940_p12)
}
  0x3b   :  { %s944_s28 = scalar_lea.vmem %s1098_s12, 2048  ;;  %p949_p0 = scmp.lt.s32.totalorder %s1098_s12, %s1098_s12 }
  0x3c   :  { %p945_p13 = scmp.ne.s32.totalorder %s1098_s12, %s944_s28  ;;  %p950_p1 = scmp.lt.s32.totalorder %s944_s28, %s944_s28 }
  0x3e   :  { %p951_p2 = por %p950_p1, %p949_p0 }
  0x40   :  { %p952_p3 = pnand %p951_p2, %p945_p13 }
  0x42   :  { %955 = shalt.err (!%p952_p3)
}
  0x43   :  { %52 = dma.hbm_to_vmem [thread:$0]  %s1176_s2, 2048, %s1098_s12, [#allocation6], %s1010_s17, %s1010_s17, %s1011_s18  }
  0x44   :  { %s1014_s10 = smov [#allocation10]   ;;  %s956_s15 = scalar_lea.hbm %s1180_s6, 2048 }
  0x45   :  { %s74_s11 = sshll.u32 %s1014_s10, 4  ;;  %p957_p4 = scmp.ne.s32.totalorder %s1180_s6, %s956_s15  ;;  %s75_s11 = int_to_ptr.vmem [resolvable:$true] %s74_s11 }
  0x46   :  { %p960_p5 = scmp.lt.u32.totalorder %s956_s15, %s1180_s6 }
  0x48   :  { %p962_p6 = pnand %p960_p5, %p957_p4 }
  0x4a   :  { %965 = shalt.err (!%p962_p6)
}
  0x4b   :  { %s966_s4 = scalar_lea.vmem %s75_s11, 2048  ;;  %p971_p8 = scmp.lt.s32.totalorder %s75_s11, %s75_s11 }
  0x4c   :  { %p967_p7 = scmp.ne.s32.totalorder %s75_s11, %s966_s4  ;;  %p972_p9 = scmp.lt.s32.totalorder %s966_s4, %s966_s4 }
  0x4e   :  { %p973_p10 = por %p972_p9, %p971_p8 }
  0x50   :  { %p974_p11 = pnand %p973_p10, %p967_p7 }
  0x52   :  { %977 = shalt.err (!%p974_p11)
}
  0x53   :  { %80 = dma.hbm_to_vmem [thread:$0]  %s1180_s6, 2048, %s75_s11, [#allocation9], %s1010_s17, %s1010_s17, %s1011_s18  }
  0x54   :  { %1000 = dma.done.wait [#allocation3], 1024  }
  0x55   :  { %1001 = vsyncadd [#allocation3], 4294966272 }
  0x56   :  { %1002 = dma.done.wait [#allocation6], 3072  }
  0x57   :  { %1003 = vsyncadd [#allocation6], 4294964224 }
  0x58   :  { %1004 = dma.done.wait [#allocation9], 4096  }
  0x59   :  { %1005 = vsyncadd [#allocation9], 4294963200  ;;  %v114_v0 = vld [vmem:[#allocation7] sm:$0xff]  ;;  %v115_v1 = vld [vmem:[#allocation7 + $0x8] sm:$0xff]  ;;  %s1015_s24 = smov [#allocation11]  }
  0x5a   :  { %v242_v2 = vld [vmem:[#allocation8] sm:$0xff]  ;;  %v748_v3 = vpack.c.bf16 %v115_v1, %v114_v0  ;;  %v243_v4 = vld [vmem:[#allocation8 + $0x8] sm:$0xff]  ;;  %v116_v5 = vld [vmem:[#allocation7 + $0x10] sm:$0xff]  ;;  %s527_s25 = sshll.u32 %s1015_s24, 4  ;;  %s528_s25 = int_to_ptr.vmem [resolvable:$true] %s527_s25 }
  0x5b   :  { %v117_v6 = vld [vmem:[#allocation7 + $0x18] sm:$0xff]  ;;  %v780_v7 = vpack.c.bf16 %v243_v4, %v242_v2  ;;  %v244_v9 = vld [vmem:[#allocation8 + $0x10] sm:$0xff]  ;;  %v118_v11 = vld [vmem:[#allocation7 + $0x20] sm:$0xff]  ;;  %p983_p13 = scmp.lt.s32.totalorder %s528_s25, %s528_s25 }
  0x5c   :  { %v752_v8 = vpack.c.bf16 %v117_v6, %v116_v5  ;;  %v245_v10 = vld [vmem:[#allocation8 + $0x18] sm:$0xff]  ;;  %749 = vmatprep.subr.bf16.mxu0 %v748_v3  ;;  %v119_v13 = vld [vmem:[#allocation7 + $0x28] sm:$0xff]  ;;  %v246_v14 = vld [vmem:[#allocation8 + $0x20] sm:$0xff] }
  0x5d   :  { %v784_v12 = vpack.c.bf16 %v245_v10, %v244_v9  ;;  %v247_v15 = vld [vmem:[#allocation8 + $0x28] sm:$0xff]  ;;  %751 = vmatpush3.bf16.msra.mxu0 %v748_v3  ;;  %781 = vmatprep.subr.bf16.mxu1 %v780_v7  ;;  %v756_v16 = vpack.c.bf16 %v119_v13, %v118_v11  ;;  %v120_v18 = vld [vmem:[#allocation7 + $0x30] sm:$0xff]  ;;  %v121_v19 = vld [vmem:[#allocation7 + $0x38] sm:$0xff] }
  0x5e   :  { %783 = vmatpush3.bf16.msra.mxu1 %v780_v7  ;;  %753 = vmatprep.subr.bf16.mxu0 %v752_v8  ;;  %v788_v17 = vpack.c.bf16 %v247_v15, %v246_v14  ;;  %v248_v20 = vld [vmem:[#allocation8 + $0x30] sm:$0xff]  ;;  %v249_v21 = vld [vmem:[#allocation8 + $0x38] sm:$0xff]  ;;  %v760_v22 = vpack.c.bf16 %v121_v19, %v120_v18  ;;  %v122_v24 = vld [vmem:[#allocation7 + $0x40] sm:$0xff] }
  0x5f   :  { %785 = vmatprep.subr.bf16.mxu1 %v784_v12  ;;  %v792_v23 = vpack.c.bf16 %v249_v21, %v248_v20  ;;  %v123_v25 = vld [vmem:[#allocation7 + $0x48] sm:$0xff]  ;;  %v98_v26 = vld [vmem:[#allocation2] sm:$0xff]  ;;  %v124_v31 = vld [vmem:[#allocation7 + $0x50] sm:$0xff] }
  0x60   :  { %v250_v27 = vld [vmem:[#allocation8 + $0x40] sm:$0xff]  ;;  %v251_v28 = vld [vmem:[#allocation8 + $0x48] sm:$0xff]  ;;  %648 = vmatprep.mubr.f32.mxu0 %v98_v26  ;;  %692 = vmatprep.mubr.f32.mxu1 %v98_v26  ;;  %v764_v29 = vpack.c.bf16 %v123_v25, %v122_v24  ;;  %v125_v32 = vld [vmem:[#allocation7 + $0x58] sm:$0xff] }
  0x61   :  { %755 = vmatpush3.bf16.msra.mxu0 %v752_v8  ;;  %v796_v30 = vpack.c.bf16 %v251_v28, %v250_v27  ;;  %v252_v33 = vld [vmem:[#allocation8 + $0x50] sm:$0xff]  ;;  %v253_v34 = vld [vmem:[#allocation8 + $0x58] sm:$0xff]  ;;  %v768_v35 = vpack.c.bf16 %v125_v32, %v124_v31  ;;  %v126_v37 = vld [vmem:[#allocation7 + $0x60] sm:$0xff] }
  0x62   :  { %787 = vmatpush3.bf16.msra.mxu1 %v784_v12  ;;  %757 = vmatprep.subr.bf16.mxu0 %v756_v16  ;;  %v800_v36 = vpack.c.bf16 %v253_v34, %v252_v33  ;;  %v127_v38 = vld [vmem:[#allocation7 + $0x68] sm:$0xff]  ;;  %v254_v39 = vld [vmem:[#allocation8 + $0x60] sm:$0xff]  ;;  %v128_v43 = vld [vmem:[#allocation7 + $0x70] sm:$0xff] }
  0x63   :  { %789 = vmatprep.subr.bf16.mxu1 %v788_v17  ;;  %v255_v40 = vld [vmem:[#allocation8 + $0x68] sm:$0xff]  ;;  %v772_v41 = vpack.c.bf16 %v127_v38, %v126_v37  ;;  %v129_v44 = vld [vmem:[#allocation7 + $0x78] sm:$0xff]  ;;  %v256_v45 = vld [vmem:[#allocation8 + $0x70] sm:$0xff] }
  0x64   :  { %v804_v42 = vpack.c.bf16 %v255_v40, %v254_v39  ;;  %v257_v46 = vld [vmem:[#allocation8 + $0x78] sm:$0xff]  ;;  %v776_v47 = vpack.c.bf16 %v129_v44, %v128_v43  ;;  %v386_v49 = vld [vmem:[#allocation10] sm:$0xff]  ;;  %v387_v50 = vld [vmem:[#allocation10 + $0x8] sm:$0xff] }
  0x65   :  { %759 = vmatpush3.bf16.msra.mxu0 %v756_v16  ;;  %v808_v48 = vpack.c.bf16 %v257_v46, %v256_v45  ;;  %v812_v51 = vpack.c.bf16 %v387_v50, %v386_v49  ;;  %v388_v52 = vld [vmem:[#allocation10 + $0x10] sm:$0xff]  ;;  %v389_v53 = vld [vmem:[#allocation10 + $0x18] sm:$0xff]  ;;  %v99_v54 = vld [vmem:[#allocation2 + $0x8] sm:$0xff] }
  0x66   :  { %791 = vmatpush3.bf16.msra.mxu1 %v788_v17  ;;  %761 = vmatprep.subr.bf16.mxu0 %v760_v22  ;;  %v100_v55 = vld [vmem:[#allocation2 + $0x10] sm:$0xff]  ;;  %v816_v56 = vpack.c.bf16 %v389_v53, %v388_v52  ;;  %v390_v57 = vld [vmem:[#allocation10 + $0x20] sm:$0xff]  ;;  %v391_v58 = vld [vmem:[#allocation10 + $0x28] sm:$0xff] }
  0x67   :  { %793 = vmatprep.subr.bf16.mxu1 %v792_v23  ;;  %v101_v59 = vld [vmem:[#allocation2 + $0x18] sm:$0xff]  ;;  %v102_v60 = vld [vmem:[#allocation2 + $0x20] sm:$0xff]  ;;  %v820_v61 = vpack.c.bf16 %v391_v58, %v390_v57  ;;  %v392_v62 = vld [vmem:[#allocation10 + $0x30] sm:$0xff] }
  0x68   :  { %v393_v63 = vld [vmem:[#allocation10 + $0x38] sm:$0xff]  ;;  %v103_v0 = vld [vmem:[#allocation2 + $0x28] sm:$0xff]  ;;  %v104_v1 = vld [vmem:[#allocation2 + $0x30] sm:$0xff] }
  0x69   :  { %763 = vmatpush3.bf16.msra.mxu0 %v760_v22  ;;  %v824_v2 = vpack.c.bf16 %v393_v63, %v392_v62  ;;  %v394_v3 = vld [vmem:[#allocation10 + $0x40] sm:$0xff]  ;;  %v395_v4 = vld [vmem:[#allocation10 + $0x48] sm:$0xff]  ;;  %v105_v5 = vld [vmem:[#allocation2 + $0x38] sm:$0xff] }
  0x6a   :  { %795 = vmatpush3.bf16.msra.mxu1 %v792_v23  ;;  %765 = vmatprep.subr.bf16.mxu0 %v764_v29  ;;  %v828_v6 = vpack.c.bf16 %v395_v4, %v394_v3  ;;  %v396_v7 = vld [vmem:[#allocation10 + $0x50] sm:$0xff]  ;;  %v397_v8 = vld [vmem:[#allocation10 + $0x58] sm:$0xff]  ;;  %v398_v10 = vld [vmem:[#allocation10 + $0x60] sm:$0xff] }
  0x6b   :  { %797 = vmatprep.subr.bf16.mxu1 %v796_v30  ;;  %v832_v9 = vpack.c.bf16 %v397_v8, %v396_v7  ;;  %v399_v11 = vld [vmem:[#allocation10 + $0x68] sm:$0xff]  ;;  %v400_v13 = vld [vmem:[#allocation10 + $0x70] sm:$0xff]  ;;  %v401_v14 = vld [vmem:[#allocation10 + $0x78] sm:$0xff] }
  0x6c   :  { %v836_v12 = vpack.c.bf16 %v399_v11, %v398_v10  ;;  %v840_v15 = vpack.c.bf16 %v401_v14, %v400_v13  ;;  %v541_v16 = vld [vmem:[%s1177_s3] ss:$0 sm:$0xff]  ;;  %v107_v18 = vld [vmem:[#allocation5 + $0x8] sm:$0xff]  ;;  %v108_v34 = vld [vmem:[#allocation5 + $0x10] sm:$0xff] }
  0x6d   :  { %767 = vmatpush3.bf16.msra.mxu0 %v764_v29  ;;  %v542_v17 = vld [vmem:[%s1179_s5] ss:$0 sm:$0xff]  ;;  %v111_v44 = vld [vmem:[#allocation5 + $0x28] sm:$0xff]  ;;  %v113_v58 = vld [vmem:[#allocation5 + $0x38] sm:$0xff] }
  0x6e   :  { %799 = vmatpush3.bf16.msra.mxu1 %v796_v30  ;;  %769 = vmatprep.subr.bf16.mxu0 %v768_v35  ;;  %v106_v21 = vld [vmem:[#allocation5] sm:$0xff]  ;;  %v109_v30 = vld [vmem:[#allocation5 + $0x18] sm:$0xff]  ;;  %v112_v62 = vld [vmem:[#allocation5 + $0x30] sm:$0xff] }
  0x6f   :  { %801 = vmatprep.subr.bf16.mxu1 %v800_v36  ;;  %v543_v10 = vld [vmem:[%s1181_s7] ss:$0 sm:$0xff]  ;;  %s978_s7 = scalar_lea.vmem %s528_s25, 1024 }
  0x70   :  { %p979_p12 = scmp.ne.s32.totalorder %s528_s25, %s978_s7  ;;  %p984_p0 = scmp.lt.s32.totalorder %s978_s7, %s978_s7 }
  0x71   :  { %771 = vmatpush3.bf16.msra.mxu0 %v768_v35 }
  0x72   :  { %803 = vmatpush3.bf16.msra.mxu1 %v800_v36  ;;  %773 = vmatprep.subr.bf16.mxu0 %v772_v41  ;;  %p985_p1 = por %p984_p0, %p983_p13 }
  0x73   :  { %805 = vmatprep.subr.bf16.mxu1 %v804_v42 }
  0x74   :  { %p986_p2 = pnand %p985_p1, %p979_p12 }
  0x75   :  { %775 = vmatpush3.bf16.msra.mxu0 %v772_v41 }
  0x76   :  { %807 = vmatpush3.bf16.msra.mxu1 %v804_v42  ;;  %777 = vmatprep.subr.bf16.mxu0 %v776_v47 }
  0x77   :  { %809 = vmatprep.subr.bf16.mxu1 %v808_v48 }
  0x79   :  { %779 = vmatpush3.bf16.msra.mxu0 %v776_v47 }
  0x7a   :  { %811 = vmatpush3.bf16.msra.mxu1 %v808_v48  ;;  %813 = vmatprep.subr.bf16.mxu0 %v812_v51  ;;  %v110_v48 = vld [vmem:[#allocation5 + $0x20] sm:$0xff] }
  0x7b   :  { %844 = vmatprep.subr.bf16.mxu1 %v812_v51 }
  0x7c   :  { %649 = vmatmul.mubr.f32.vlgmr.msra.gmra.mrb[0].mxu0 %v99_v54 }
  0x7d   :  { %693 = vmatmul.mubr.f32.vlgmr.msra.gmra.mrb[0].mxu1 %v99_v54  ;;  %651 = vmatprep.mubr.f32.mxu0 %v100_v55 }
  0x7e   :  { %695 = vmatprep.mubr.f32.mxu1 %v100_v55  ;;  %815 = vmatpush3.bf16.msra.mxu0 %v812_v51 }
  0x7f   :  { %817 = vmatprep.subr.bf16.mxu0 %v816_v56  ;;  %852 = vmatpush3.bf16.msra.mxu1 %v812_v51 }
  0x80   :  { %652 = vmatmul.mubr.f32.gmra.mrb[2].mxu0 %v101_v59  ;;  %845 = vmatprep.subr.bf16.mxu1 %v816_v56 }
  0x81   :  { %696 = vmatmul.mubr.f32.gmra.mrb[2].mxu1 %v101_v59  ;;  %654 = vmatprep.mubr.f32.mxu0 %v102_v60 }
  0x82   :  { %698 = vmatprep.mubr.f32.mxu1 %v102_v60  ;;  %819 = vmatpush3.bf16.msra.mxu0 %v816_v56 }
  0x83   :  { %821 = vmatprep.subr.bf16.mxu0 %v820_v61  ;;  %853 = vmatpush3.bf16.msra.mxu1 %v816_v56 }
  0x84   :  { %655 = vmatmul.mubr.f32.gmra.mrb[4].mxu0 %v103_v0  ;;  %846 = vmatprep.subr.bf16.mxu1 %v820_v61 }
  0x85   :  { %699 = vmatmul.mubr.f32.gmra.mrb[4].mxu1 %v103_v0  ;;  %657 = vmatprep.mubr.f32.mxu0 %v104_v1 }
  0x86   :  { %701 = vmatprep.mubr.f32.mxu1 %v104_v1  ;;  %823 = vmatpush3.bf16.msra.mxu0 %v820_v61 }
  0x87   :  { %825 = vmatprep.subr.bf16.mxu0 %v824_v2  ;;  %854 = vmatpush3.bf16.msra.mxu1 %v820_v61 }
  0x88   :  { %658 = vmatmul.mubr.f32.gmra.mrb[6].mxu0 %v105_v5  ;;  %847 = vmatprep.subr.bf16.mxu1 %v824_v2 }
  0x89   :  { %702 = vmatmul.mubr.f32.gmra.mrb[6].mxu1 %v105_v5 }
  0x8a   :  { %827 = vmatpush3.bf16.msra.mxu0 %v824_v2 }
  0x8b   :  { %829 = vmatprep.subr.bf16.mxu0 %v828_v6  ;;  %855 = vmatpush3.bf16.msra.mxu1 %v824_v2 }
  0x8c   :  { %848 = vmatprep.subr.bf16.mxu1 %v828_v6 }
  0x8e   :  { %831 = vmatpush3.bf16.msra.mxu0 %v828_v6 }
  0x8f   :  { %833 = vmatprep.subr.bf16.mxu0 %v832_v9  ;;  %856 = vmatpush3.bf16.msra.mxu1 %v828_v6 }
  0x90   :  { %849 = vmatprep.subr.bf16.mxu1 %v832_v9 }
  0x92   :  { %835 = vmatpush3.bf16.msra.mxu0 %v832_v9 }
  0x93   :  { %857 = vmatpush3.bf16.msra.mxu1 %v832_v9  ;;  %837 = vmatprep.subr.bf16.mxu0 %v836_v12 }
  0x94   :  { %850 = vmatprep.subr.bf16.mxu1 %v836_v12 }
  0x96   :  { %839 = vmatpush3.bf16.msra.mxu0 %v836_v12 }
  0x97   :  { %858 = vmatpush3.bf16.msra.mxu1 %v836_v12  ;;  %841 = vmatprep.subr.bf16.mxu0 %v840_v15 }
  0x98   :  { %851 = vmatprep.subr.bf16.mxu1 %v840_v15 }
  0x9a   :  { %843 = vmatpush3.bf16.msra.mxu0 %v840_v15 }
  0x9b   :  { %859 = vmatpush3.bf16.msra.mxu1 %v840_v15 }
 0x14f   :  { %v650_v19 = vpop.f32.mrb[0].mxu0 }
 0x150   :  { %v209_v20 = vadd.f32 %v650_v19, %v541_v16  ;;  %v203_v22 = vpop.f32.mrb[1].mxu0  ;;  %v694_v23 = vpop.f32.mrb[0].mxu1 }
 0x151   :  { %v204_v24 = vadd.f32 %v541_v16, %v203_v22  ;;  %v337_v25 = vadd.f32 %v694_v23, %v542_v17  ;;  %v331_v26 = vpop.f32.mrb[1].mxu1 }
 0x152   :  { %v371_v27 = vmul.f32 %v209_v20, %v107_v18  ;;  %v332_v28 = vadd.f32 %v542_v17, %v331_v26 }
 0x153   :  { %v370_v29 = vmul.f32 %v204_v24, %v106_v21  ;;  %v653_v31 = vpop.f32.mrb[2].mxu0 }
 0x154   :  { %v379_v32 = vadd.f32 %v371_v27, %v337_v25  ;;  %v219_v33 = vadd.f32 %v653_v31, %v541_v16  ;;  %v213_v35 = vpop.f32.mrb[3].mxu0  ;;  %v697_v36 = vpop.f32.mrb[2].mxu1 }
 0x155   :  { %v378_v37 = vadd.f32 %v370_v29, %v332_v28  ;;  %v214_v38 = vadd.f32 %v541_v16, %v213_v35  ;;  %v347_v39 = vadd.f32 %v697_v36, %v542_v17  ;;  %v341_v40 = vpop.f32.mrb[3].mxu1 }
 0x156   :  { %v373_v41 = vmul.f32 %v219_v33, %v109_v30  ;;  %v342_v42 = vadd.f32 %v542_v17, %v341_v40 }
 0x157   :  { %v372_v43 = vmul.f32 %v214_v38, %v108_v34  ;;  %v656_v45 = vpop.f32.mrb[4].mxu0  ;;  %736 = vmatprep.mubr.f32.mxu0 %v378_v37 }
 0x158   :  { %v381_v46 = vadd.f32 %v373_v41, %v347_v39  ;;  %v229_v47 = vadd.f32 %v656_v45, %v541_v16  ;;  %v223_v49 = vpop.f32.mrb[5].mxu0  ;;  %v700_v50 = vpop.f32.mrb[4].mxu1  ;;  %737 = vmatmul.mubr.f32.vlgmr.msra.gmra.mrb[8].mxu0 %v379_v32 }
 0x159   :  { %v380_v51 = vadd.f32 %v372_v43, %v342_v42  ;;  %v224_v52 = vadd.f32 %v541_v16, %v223_v49  ;;  %v357_v53 = vadd.f32 %v700_v50, %v542_v17  ;;  %v351_v54 = vpop.f32.mrb[5].mxu1 }
 0x15a   :  { %v375_v55 = vmul.f32 %v229_v47, %v111_v44  ;;  %v352_v56 = vadd.f32 %v542_v17, %v351_v54 }
 0x15b   :  { %v374_v57 = vmul.f32 %v224_v52, %v110_v48  ;;  %v659_v59 = vpop.f32.mrb[6].mxu0  ;;  %739 = vmatprep.mubr.f32.mxu0 %v380_v51 }
 0x15c   :  { %v383_v60 = vadd.f32 %v375_v55, %v357_v53  ;;  %v239_v61 = vadd.f32 %v659_v59, %v541_v16  ;;  %v233_v63 = vpop.f32.mrb[7].mxu0  ;;  %v703_v0 = vpop.f32.mrb[6].mxu1  ;;  %740 = vmatmul.mubr.f32.gmra.mrb[10].mxu0 %v381_v46 }
 0x15d   :  { %v382_v1 = vadd.f32 %v374_v57, %v352_v56  ;;  %v234_v2 = vadd.f32 %v541_v16, %v233_v63  ;;  %v367_v3 = vadd.f32 %v703_v0, %v542_v17  ;;  %v361_v4 = vpop.f32.mrb[7].mxu1 }
 0x15e   :  { %v377_v5 = vmul.f32 %v239_v61, %v113_v58  ;;  %v362_v6 = vadd.f32 %v542_v17, %v361_v4 }
 0x15f   :  { %v376_v7 = vmul.f32 %v234_v2, %v112_v62  ;;  %742 = vmatprep.mubr.f32.mxu1 %v382_v1 }
 0x160   :  { %v385_v8 = vadd.f32 %v377_v5, %v367_v3  ;;  %743 = vmatmul.mubr.f32.vlgmr.msra.gmra.mrb[8].mxu1 %v383_v60 }
 0x161   :  { %v384_v9 = vadd.f32 %v376_v7, %v362_v6 }
 0x163   :  { %745 = vmatprep.mubr.f32.mxu1 %v384_v9 }
 0x164   :  { %746 = vmatmul.mubr.f32.gmra.mrb[10].mxu1 %v385_v8 }
 0x22b   :  { %v738_v11 = vpop.f32.mrb[8].mxu0 }
 0x22c   :  { %v481_v12 = vadd.f32 %v738_v11, %v543_v10  ;;  %v475_v13 = vpop.f32.mrb[9].mxu0 }
 0x22d   :  { %v476_v14 = vadd.f32 %v543_v10, %v475_v13 }
 0x22e   :  { %515 = vst [vmem:[#allocation11 + $0x8] sm:$0xff] %v481_v12 }
 0x22f   :  { %514 = vst [vmem:[#allocation11] sm:$0xff] %v476_v14  ;;  %v741_v15 = vpop.f32.mrb[10].mxu0 }
 0x230   :  { %v491_v16 = vadd.f32 %v741_v15, %v543_v10  ;;  %v485_v17 = vpop.f32.mrb[11].mxu0 }
 0x231   :  { %v486_v18 = vadd.f32 %v543_v10, %v485_v17 }
 0x232   :  { %517 = vst [vmem:[#allocation11 + $0x18] sm:$0xff] %v491_v16 }
 0x233   :  { %516 = vst [vmem:[#allocation11 + $0x10] sm:$0xff] %v486_v18  ;;  %v744_v19 = vpop.f32.mrb[8].mxu1 }
 0x234   :  { %v501_v20 = vadd.f32 %v744_v19, %v543_v10  ;;  %v495_v21 = vpop.f32.mrb[9].mxu1 }
 0x235   :  { %v496_v22 = vadd.f32 %v543_v10, %v495_v21 }
 0x236   :  { %519 = vst [vmem:[#allocation11 + $0x28] sm:$0xff] %v501_v20 }
 0x237   :  { %518 = vst [vmem:[#allocation11 + $0x20] sm:$0xff] %v496_v22  ;;  %v747_v23 = vpop.f32.mrb[10].mxu1 }
 0x238   :  { %v511_v24 = vadd.f32 %v747_v23, %v543_v10  ;;  %v505_v25 = vpop.f32.mrb[11].mxu1 }
 0x239   :  { %v506_v26 = vadd.f32 %v543_v10, %v505_v25 }
 0x23a   :  { %521 = vst [vmem:[#allocation11 + $0x38] sm:$0xff] %v511_v24 }
 0x23b   :  { %520 = vst [vmem:[#allocation11 + $0x30] sm:$0xff] %v506_v26 }
 0x23c   :  { %989 = shalt.err (!%p986_p2)
}
 0x23d   :  { %s990_s29 = scalar_lea.hbm %s1182_s8, 1024 }
 0x23e   :  { %p991_p3 = scmp.ne.s32.totalorder %s1182_s8, %s990_s29  ;;  %p994_p4 = scmp.lt.u32.totalorder %s990_s29, %s1182_s8 }
 0x240   :  { %p996_p5 = pnand %p994_p4, %p991_p3 }
 0x242   :  { %999 = shalt.err (!%p996_p5)
}
 0x243   :  { %533 = dma.vmem_to_hbm [thread:$0]  %s528_s25, 1024, %s1182_s8, [#allocation4], %s1010_s17, %s1010_s17, %s1011_s18  }
 0x244   :  { %1006 = dma.done.wait [#allocation4], 1024  }
 0x245   :  { %1007 = vsyncadd [#allocation4], 4294966272 }
 0x246   :  { %537 = vsyncpa [#allocation3], 1 }
 0x247   :  { %538 = vsyncpa [#allocation6], 1 }
 0x248   :  { %539 = vsyncpa [#allocation9], 1 }
 0x249   :  { %540 = vsyncpa [#allocation4], 1 }

</bundles_post_ra>
